<compile_context>
chip_gen: v7x
topology: tpu7x:2x2x1
jax: 0.10.0
libtpu: 0.0.40
codegen_flags: <defaults>
</compile_context>

<pallas_src>
import functools

import jax
import jax.numpy as jnp
from jax.experimental import pallas as pl
from jax.experimental.pallas import tpu as pltpu


def _round_up(n: int, m: int) -> int:
    return ((n + m - 1) // m) * m


def rff_mlp_kernel(x_ref, w0_ref, b0_ref, w1_ref, b1_ref, o_ref):
    # Layer 0: Linear.  Operands stay in native dtype; accumulate in f32.
    h = jnp.dot(x_ref[...], w0_ref[...], preferred_element_type=jnp.float32)
    h = h + b0_ref[...].astype(jnp.float32)          # [1, H] broadcasts over [TM, H]

    # Layer 1: Linear, then cos (the RFF readout).
    z = jnp.dot(h.astype(w1_ref.dtype), w1_ref[...],
                preferred_element_type=jnp.float32)
    z = z + b1_ref[...].astype(jnp.float32)          # [1, D_out] broadcasts
    o_ref[...] = jnp.cos(z).astype(o_ref.dtype)


@functools.partial(jax.jit, static_argnames=("block_batch", "out_dtype"))
def rff_mlp(x, w0, b0, w1, b1, *, block_batch=512, out_dtype=None):
    """y = cos((x @ w0 + b0) @ w1 + b1).

    x  : [B, D_in]
    w0 : [D_in, H]     (transposed from PyTorch nn.Linear's [H, D_in])
    b0 : [H]
    w1 : [H, D_out]    (transposed from PyTorch nn.Linear's [D_out, H])
    b1 : [D_out]
    """
    B, D_in = x.shape
    H = w0.shape[1]
    D_out = w1.shape[1]
    odt = x.dtype if out_dtype is None else out_dtype

    # Lane-dense padding: feature dims -> multiple of 128; batch -> multiple of
    # the batch tile (itself a multiple of 8 sublanes).
    d_in_p = _round_up(D_in, 128)
    h_p = _round_up(H, 128)
    d_out_p = _round_up(D_out, 128)
    tm = min(block_batch, _round_up(B, 8))      # batch tile (VMEM-safe on v7x)
    b_p = _round_up(B, tm)

    x_p = jnp.zeros((b_p, d_in_p), x.dtype).at[:B, :D_in].set(x)
    w0_p = jnp.zeros((d_in_p, h_p), w0.dtype).at[:D_in, :H].set(w0)
    b0_p = jnp.zeros((1, h_p), b0.dtype).at[0, :H].set(b0)
    w1_p = jnp.zeros((h_p, d_out_p), w1.dtype).at[:H, :D_out].set(w1)
    b1_p = jnp.zeros((1, d_out_p), b1.dtype).at[0, :D_out].set(b1)

    out_p = pl.pallas_call(
        rff_mlp_kernel,
        out_shape=jax.ShapeDtypeStruct((b_p, d_out_p), odt),
        grid=(b_p // tm,),
        in_specs=[
            # x: tiled over the batch; pipeline double-buffers this tile.
            pl.BlockSpec((tm, d_in_p), lambda i: (i, 0)),
            # Weights / biases: constant block index -> stay VMEM-resident.
            pl.BlockSpec((d_in_p, h_p), lambda i: (0, 0)),
            pl.BlockSpec((1, h_p), lambda i: (0, 0)),
            pl.BlockSpec((h_p, d_out_p), lambda i: (0, 0)),
            pl.BlockSpec((1, d_out_p), lambda i: (0, 0)),
        ],
        out_specs=pl.BlockSpec((tm, d_out_p), lambda i: (i, 0)),
        compiler_params=pltpu.CompilerParams(
            dimension_semantics=("parallel",)),
    )(x_p, w0_p, b0_p, w1_p, b1_p)

    return out_p[:B, :D_out]


def init_rff_params(key, input_dim, hidden_dim, output_dim, dtype=jnp.float32):
    """normal(0, 1) init for both layers' weights and biases (matches the
    PyTorch module); weights stored transposed ([in, out]) for row-major
    MXU matmuls."""
    k0w, k0b, k1w, k1b = jax.random.split(key, 4)
    w0 = jax.random.normal(k0w, (input_dim, hidden_dim), dtype)
    b0 = jax.random.normal(k0b, (hidden_dim,), dtype)
    w1 = jax.random.normal(k1w, (hidden_dim, output_dim), dtype)
    b1 = jax.random.normal(k1b, (output_dim,), dtype)
    return w0, b0, w1, b1


def rff_mlp_ref(x, w0, b0, w1, b1):
    hp = jax.lax.Precision.HIGHEST
    h = jnp.dot(x, w0, preferred_element_type=jnp.float32,
                precision=hp) + b0.astype(jnp.float32)
    z = jnp.dot(h.astype(w1.dtype), w1, preferred_element_type=jnp.float32,
                precision=hp) + b1.astype(jnp.float32)
    return jnp.cos(z)


if __name__ == "__main__":
    key = jax.random.PRNGKey(0)
    kx, kp = jax.random.split(key)

    B, D_IN, D_HID, D_OUT = 8, 32, 64, 16
    x = jax.random.normal(kx, (B, D_IN), dtype=jnp.float32)
    w0, b0, w1, b1 = init_rff_params(kp, D_IN, D_HID, D_OUT, dtype=jnp.float32)

    # f32 correctness check (kernel never upcasts; f32 stays f32).
    out = jax.block_until_ready(rff_mlp(x, w0, b0, w1, b1))
    ref = rff_mlp_ref(x, w0, b0, w1, b1)
    assert out.shape == (B, D_OUT)
    assert jnp.allclose(out, ref, atol=5e-3, rtol=5e-3), "mismatch vs reference"

    # bf16 operands (recommended for throughput): MXU runs at full rate while
    # accumulation stays f32 inside the kernel.  cos of O(50) arguments is
    # sensitive to bf16 operand rounding, so only sanity-check this path.
    xb, w0b, b0b, w1b, b1b = (a.astype(jnp.bfloat16) for a in (x, w0, b0, w1, b1))
    out_bf16 = jax.block_until_ready(
        rff_mlp(xb, w0b, b0b, w1b, b1b, out_dtype=jnp.float32))
    assert out_bf16.shape == (B, D_OUT)
    assert bool(jnp.all(jnp.isfinite(out_bf16)))

    print("KERNEL_OK")
</pallas_src>

<mosaic_0001>
module attributes {stable_mosaic.version = 11 : i64} {
  func.func @rff_mlp_kernel(%arg0: i32, %arg1: memref<8x128xf32, #tpu.memory_space<vmem>>, %arg2: memref<128x128xf32, #tpu.memory_space<vmem>>, %arg3: memref<1x128xf32, #tpu.memory_space<vmem>>, %arg4: memref<128x128xf32, #tpu.memory_space<vmem>>, %arg5: memref<1x128xf32, #tpu.memory_space<vmem>>, %arg6: memref<8x128xf32, #tpu.memory_space<vmem>>) attributes {dimension_semantics = [#tpu.dimension_semantics<parallel>], iteration_bounds = array<i64: 1>, scalar_prefetch = 0 : i64, scratch_operands = 0 : i64, tpu.core_type = #tpu.core_type<tc>, window_params = [{transform_indices = @transform_0, window_bounds = array<i64: 8, 128>}, {pipeline_mode = #tpu.pipeline_mode<synchronous>, transform_indices = @transform_1, window_bounds = array<i64: 128, 128>}, {pipeline_mode = #tpu.pipeline_mode<synchronous>, transform_indices = @transform_2, window_bounds = array<i64: 1, 128>}, {pipeline_mode = #tpu.pipeline_mode<synchronous>, transform_indices = @transform_3, window_bounds = array<i64: 128, 128>}, {pipeline_mode = #tpu.pipeline_mode<synchronous>, transform_indices = @transform_4, window_bounds = array<i64: 1, 128>}, {transform_indices = @transform_5, window_bounds = array<i64: 8, 128>}]} {
    %c0 = arith.constant 0 : index
    %c0_0 = arith.constant 0 : index
    %0 = vector.load %arg1[%c0, %c0_0] : memref<8x128xf32, #tpu.memory_space<vmem>>, vector<8x128xf32>
    %c0_1 = arith.constant 0 : index
    %c0_2 = arith.constant 0 : index
    %1 = vector.load %arg2[%c0_1, %c0_2] : memref<128x128xf32, #tpu.memory_space<vmem>>, vector<128x128xf32>
    %cst = arith.constant dense<0.000000e+00> : vector<8x128xf32>
    %2 = tpu.matmul %0, %1, %cst {dimension_numbers = #tpu.dot_dimension_numbers<[1], [0], [0], [1], [0, 0, 1, 1], [], []>} : vector<8x128xf32>, vector<128x128xf32>, vector<8x128xf32> -> vector<8x128xf32>
    %c0_3 = arith.constant 0 : index
    %c0_4 = arith.constant 0 : index
    %3 = vector.load %arg3[%c0_3, %c0_4] : memref<1x128xf32, #tpu.memory_space<vmem>>, vector<1x128xf32>
    %4 = vector.broadcast %3 : vector<1x128xf32> to vector<8x128xf32>
    %5 = arith.addf %2, %4 : vector<8x128xf32>
    %c0_5 = arith.constant 0 : index
    %c0_6 = arith.constant 0 : index
    %6 = vector.load %arg4[%c0_5, %c0_6] : memref<128x128xf32, #tpu.memory_space<vmem>>, vector<128x128xf32>
    %cst_7 = arith.constant dense<0.000000e+00> : vector<8x128xf32>
    %7 = tpu.matmul %5, %6, %cst_7 {dimension_numbers = #tpu.dot_dimension_numbers<[1], [0], [0], [1], [0, 0, 1, 1], [], []>} : vector<8x128xf32>, vector<128x128xf32>, vector<8x128xf32> -> vector<8x128xf32>
    %c0_8 = arith.constant 0 : index
    %c0_9 = arith.constant 0 : index
    %8 = vector.load %arg5[%c0_8, %c0_9] : memref<1x128xf32, #tpu.memory_space<vmem>>, vector<1x128xf32>
    %9 = vector.broadcast %8 : vector<1x128xf32> to vector<8x128xf32>
    %10 = arith.addf %7, %9 : vector<8x128xf32>
    %11 = math.cos %10 : vector<8x128xf32>
    %c0_10 = arith.constant 0 : index
    %c0_11 = arith.constant 0 : index
    %12 = vector.load %arg6[%c0_10, %c0_11] : memref<8x128xf32, #tpu.memory_space<vmem>>, vector<8x128xf32>
    tpu.vector_store %arg6[%c0_10, %c0_11], %11 {strides = array<i32>} : memref<8x128xf32, #tpu.memory_space<vmem>>, vector<8x128xf32>,
    return
  }
  func.func @transform_0(%arg0: i32) -> (i32, i32) {
    %c0_i32 = arith.constant 0 : i32
    %c0_i32_0 = arith.constant 0 : i32
    return %arg0, %c0_i32 : i32, i32
  }
  func.func @transform_1(%arg0: i32) -> (i32, i32) {
    %c0_i32 = arith.constant 0 : i32
    %c0_i32_0 = arith.constant 0 : i32
    %c0_i32_1 = arith.constant 0 : i32
    return %c0_i32, %c0_i32_0 : i32, i32
  }
  func.func @transform_2(%arg0: i32) -> (i32, i32) {
    %c0_i32 = arith.constant 0 : i32
    %c0_i32_0 = arith.constant 0 : i32
    %c0_i32_1 = arith.constant 0 : i32
    return %c0_i32, %c0_i32_0 : i32, i32
  }
  func.func @transform_3(%arg0: i32) -> (i32, i32) {
    %c0_i32 = arith.constant 0 : i32
    %c0_i32_0 = arith.constant 0 : i32
    %c0_i32_1 = arith.constant 0 : i32
    return %c0_i32, %c0_i32_0 : i32, i32
  }
  func.func @transform_4(%arg0: i32) -> (i32, i32) {
    %c0_i32 = arith.constant 0 : i32
    %c0_i32_0 = arith.constant 0 : i32
    %c0_i32_1 = arith.constant 0 : i32
    return %c0_i32, %c0_i32_0 : i32, i32
  }
  func.func @transform_5(%arg0: i32) -> (i32, i32) {
    %c0_i32 = arith.constant 0 : i32
    %c0_i32_0 = arith.constant 0 : i32
    return %arg0, %c0_i32 : i32, i32
  }
}

</mosaic_0001>

<bundles_post_ra>
// kernel: rff_mlp.1
= control target key start
LH: loop header
LB: loop body
LE: loop exit
PB: predicated region body
PF: predicated region fallthrough
CT: control target
= control target key end

     0   :  { %v526_v3 = vmov 0.0|0.0   ;;  %vm527_vm0 = vmmov 0   ;;  %v528_v6 = vmov 0.0   ;;  %s720_s0 = inlined_call_operand.vmem [shape: f32[8,128], index: 0, kind: input, shape index: {}]   ;;  %s721_s1 = inlined_call_operand.vmem [shape: f32[128,128], index: 1, kind: input, shape index: {}]   ;;  %s722_s2 = inlined_call_operand.vmem [shape: f32[1,128], index: 2, kind: input, shape index: {}]   ;;  %s723_s3 = inlined_call_operand.vmem [shape: f32[128,128], index: 3, kind: input, shape index: {}]   ;;  %s724_s4 = inlined_call_operand.vmem [shape: f32[1,128], index: 4, kind: input, shape index: {}]   ;;  %s725_s5 = inlined_call_operand.hbm [shape: f32[8,128], index: 5, kind: output, shape index: {}]  }
   0x1   :  { %v22_v0 = vld [vmem:[%s721_s1] sm:$0xff]  ;;  %v23_v1 = vld [vmem:[%s721_s1 + $0x8] sm:$0xff]  ;;  %v24_v2 = vld [vmem:[%s721_s1 + $0x10] sm:$0xff]  ;;  %436 = vmatprep.subr.bf16.mxu0 %v526_v3  ;;  %398 = vmatprep.mubr.msk.f32.mxu0 %vm527_vm0, %v528_v6 }
   0x2   :  { %v437_v4 = vpack.c.bf16 %v23_v1, %v22_v0  ;;  %v25_v5 = vld [vmem:[%s721_s1 + $0x18] sm:$0xff]  ;;  %460 = vmatprep.subr.bf16.mxu1 %v526_v3  ;;  %433 = vmatprep.mubr.msk.f32.mxu1 %vm527_vm0, %v528_v6  ;;  %v26_v8 = vld [vmem:[%s721_s1 + $0x20] sm:$0xff]  ;;  %v27_v9 = vld [vmem:[%s721_s1 + $0x28] sm:$0xff] }
   0x3   :  { %v440_v7 = vpack.c.bf16 %v25_v5, %v24_v2  ;;  %v115_v10 = vld [vmem:[%s723_s3] sm:$0xff]  ;;  %v116_v11 = vld [vmem:[%s723_s3 + $0x8] sm:$0xff]  ;;  %v117_v12 = vld [vmem:[%s723_s3 + $0x10] sm:$0xff]  ;;  %v443_v14 = vpack.c.bf16 %v27_v9, %v26_v8 }
   0x4   :  { %438 = vmatpush3.bf16.msra.mxu0 %v437_v4  ;;  %v118_v13 = vld [vmem:[%s723_s3 + $0x18] sm:$0xff]  ;;  %v461_v15 = vpack.c.bf16 %v116_v11, %v115_v10  ;;  %v28_v16 = vld [vmem:[%s721_s1 + $0x30] sm:$0xff]  ;;  %v119_v19 = vld [vmem:[%s723_s3 + $0x20] sm:$0xff] }
   0x5   :  { %439 = vmatprep.subr.bf16.mxu0 %v526_v3  ;;  %v29_v17 = vld [vmem:[%s721_s1 + $0x38] sm:$0xff]  ;;  %v464_v18 = vpack.c.bf16 %v118_v13, %v117_v12  ;;  %v120_v20 = vld [vmem:[%s723_s3 + $0x28] sm:$0xff] }
   0x6   :  { %462 = vmatpush3.bf16.msra.mxu1 %v461_v15 }
   0x7   :  { %463 = vmatprep.subr.bf16.mxu1 %v526_v3 }
   0x8   :  { %441 = vmatpush3.bf16.msra.mxu0 %v440_v7 }
   0x9   :  { %442 = vmatprep.subr.bf16.mxu0 %v526_v3 }
   0xa   :  { %10 = vsyncpa [#allocation3], 0  ;;  %v446_v21 = vpack.c.bf16 %v29_v17, %v28_v16  ;;  %v30_v22 = vld [vmem:[%s721_s1 + $0x40] sm:$0xff]  ;;  %v31_v23 = vld [vmem:[%s721_s1 + $0x48] sm:$0xff]  ;;  %465 = vmatpush3.bf16.msra.mxu1 %v464_v18  ;;  %v467_v24 = vpack.c.bf16 %v120_v20, %v119_v19  ;;  %v529_v6 = vmov 2102212464  }
   0xb   :  { %466 = vmatprep.subr.bf16.mxu1 %v526_v3  ;;  %v121_v25 = vld [vmem:[%s723_s3 + $0x30] sm:$0xff]  ;;  %v122_v26 = vld [vmem:[%s723_s3 + $0x38] sm:$0xff]  ;;  %v449_v27 = vpack.c.bf16 %v31_v23, %v30_v22  ;;  %v123_v31 = vld [vmem:[%s723_s3 + $0x40] sm:$0xff]  ;;  %v530_v8 = vmov 920167782  }
   0xc   :  { %444 = vmatpush3.bf16.msra.mxu0 %v443_v14  ;;  %v32_v28 = vld [vmem:[%s721_s1 + $0x50] sm:$0xff]  ;;  %v33_v29 = vld [vmem:[%s721_s1 + $0x58] sm:$0xff]  ;;  %v470_v30 = vpack.c.bf16 %v122_v26, %v121_v25  ;;  %v124_v32 = vld [vmem:[%s723_s3 + $0x48] sm:$0xff]  ;;  %v531_v12 = vmov 1326507024  }
   0xd   :  { %445 = vmatprep.subr.bf16.mxu0 %v526_v3  ;;  %v452_v33 = vpack.c.bf16 %v33_v29, %v32_v28  ;;  %v34_v34 = vld [vmem:[%s721_s1 + $0x60] sm:$0xff]  ;;  %v35_v35 = vld [vmem:[%s721_s1 + $0x68] sm:$0xff]  ;;  %v473_v36 = vpack.c.bf16 %v124_v32, %v123_v31  ;;  %v125_v37 = vld [vmem:[%s723_s3 + $0x50] sm:$0xff]  ;;  %v532_v14 = vmov 683565275  }
   0xe   :  { %468 = vmatpush3.bf16.msra.mxu1 %v467_v24  ;;  %v126_v38 = vld [vmem:[%s723_s3 + $0x58] sm:$0xff]  ;;  %v455_v39 = vpack.c.bf16 %v35_v35, %v34_v34  ;;  %v36_v40 = vld [vmem:[%s721_s1 + $0x70] sm:$0xff]  ;;  %v127_v43 = vld [vmem:[%s723_s3 + $0x60] sm:$0xff]  ;;  %v533_v16 = vmov 2475754826  }
   0xf   :  { %469 = vmatprep.subr.bf16.mxu1 %v526_v3  ;;  %v37_v41 = vld [vmem:[%s721_s1 + $0x78] sm:$0xff]  ;;  %v476_v42 = vpack.c.bf16 %v126_v38, %v125_v37  ;;  %v128_v44 = vld [vmem:[%s723_s3 + $0x68] sm:$0xff]  ;;  %v21_v47 = vld [vmem:[%s720_s0] sm:$0xff]  ;;  %v534_v19 = vmov 2131351028  }
  0x10   :  { %447 = vmatpush3.bf16.msra.mxu0 %v446_v21  ;;  %v458_v45 = vpack.c.bf16 %v37_v41, %v36_v40  ;;  %v479_v46 = vpack.c.bf16 %v128_v44, %v127_v43  ;;  %v129_v48 = vld [vmem:[%s723_s3 + $0x70] sm:$0xff]  ;;  %v130_v49 = vld [vmem:[%s723_s3 + $0x78] sm:$0xff]  ;;  %v326_v51 = vld [vmem:[%s722_s2] ss:$0 sm:$0xff]  ;;  %s535_s2 = smov [#allocation2]  }
  0x11   :  { %448 = vmatprep.subr.bf16.mxu0 %v526_v3  ;;  %v482_v50 = vpack.c.bf16 %v130_v49, %v129_v48  ;;  %v327_v55 = vld [vmem:[%s724_s4] ss:$0 sm:$0xff]  ;;  %s318_s3 = sshll.u32 %s535_s2, 4  ;;  %s319_s3 = int_to_ptr.vmem [resolvable:$true] %s318_s3 }
  0x12   :  { %471 = vmatpush3.bf16.msra.mxu1 %v470_v30  ;;  %s502_s4 = scalar_lea.vmem %s319_s3, 128  ;;  %p507_p1 = scmp.lt.s32.totalorder %s319_s3, %s319_s3 }
  0x13   :  { %472 = vmatprep.subr.bf16.mxu1 %v526_v3  ;;  %p503_p0 = scmp.ne.s32.totalorder %s319_s3, %s502_s4  ;;  %p508_p2 = scmp.lt.s32.totalorder %s502_s4, %s502_s4 }
  0x14   :  { %450 = vmatpush3.bf16.msra.mxu0 %v449_v27 }
  0x15   :  { %451 = vmatprep.subr.bf16.mxu0 %v526_v3  ;;  %p509_p3 = por %p508_p2, %p507_p1 }
  0x16   :  { %474 = vmatpush3.bf16.msra.mxu1 %v473_v36 }
  0x17   :  { %475 = vmatprep.subr.bf16.mxu1 %v526_v3  ;;  %p510_p4 = pnand %p509_p3, %p503_p0 }
  0x18   :  { %453 = vmatpush3.bf16.msra.mxu0 %v452_v33 }
  0x19   :  { %454 = vmatprep.subr.bf16.mxu0 %v526_v3 }
  0x1a   :  { %477 = vmatpush3.bf16.msra.mxu1 %v476_v42 }
  0x1b   :  { %478 = vmatprep.subr.bf16.mxu1 %v526_v3 }
  0x1c   :  { %456 = vmatpush3.bf16.msra.mxu0 %v455_v39 }
  0x1d   :  { %457 = vmatprep.subr.bf16.mxu0 %v526_v3 }
  0x1e   :  { %480 = vmatpush3.bf16.msra.mxu1 %v479_v46 }
  0x1f   :  { %481 = vmatprep.subr.bf16.mxu1 %v526_v3 }
  0x20   :  { %459 = vmatpush3.bf16.msra.mxu0 %v458_v45 }
  0x22   :  { %483 = vmatpush3.bf16.msra.mxu1 %v482_v50 }
  0x23   :  { %399 = vmatmul.mubr.f32.vlgmr.msra.gmra.mrb[0].mxu0 %v21_v47 }
  0xf6   :  { %v111_v52 = vpop.f32.mrb[0].mxu0 }
  0xf7   :  { %v112_v53 = vadd.f32 %v326_v51, %v111_v52  ;;  %v400_v54 = vpop.f32.mrb[1].mxu0 }
  0xf9   :  { %434 = vmatmul.mubr.f32.vlgmr.msra.gmra.mrb[0].mxu1 %v112_v53 }
 0x1cc   :  { %v204_v56 = vpop.f32.mrb[0].mxu1 }
 0x1cd   :  { %v687_v57 = vadd.f32 %v327_v55, %v204_v56  ;;  %v435_v58 = vpop.f32.mrb[1].mxu1 }
 0x1cf   :  { %v211_v59 = vand.u32 2139095040, %v687_v57  ;;  %v208_v60 = vand.u32 2147483647, %v687_v57  ;;  %vm210_vm8 = vcmp.lt.s32.totalorder %v687_v57, 0  ;;  %vm300_vm13 = vweird.f32 %v687_v57 }
 0x1d1   :  { %v212_v61 = vshrl.u32 %v211_v59, 23  ;;  %v215_v63 = vand.u32 8388607, %v208_v60  ;;  %vm209_vm9 = vcmp.le.f32.partialorder %v208_v60, 0.7853982 }
 0x1d3   :  { %v328_v62 = vadd.s32 4294967169, %v212_v61  ;;  %v216_v2 = vor.u32 8388608, %v215_v63 }
 0x1d5   :  { %v218_v0 = vadd.s32 1, %v328_v62  ;;  %v256_v10 = vshll.u32 %v216_v2, 8 }
 0x1d7   :  { %vm219_vm1 = vcmp.gt.s32.totalorder %v218_v0, 0 }
 0x1d8   :  { %v220_v1 = vsel %vm219_vm1, %v218_v0, 0 }
 0x1d9   :  { %v222_v3 = vand.u32 31, %v220_v1  ;;  %v221_v4 = vshrl.u32 %v220_v1, 5 }
 0x1db   :  { %v223_v5 = vsub.s32 32, %v222_v3  ;;  %v234_v7 = vshll.u32 %v529_v6, %v222_v3  ;;  %v237_v9 = vshll.u32 %v530_v8, %v222_v3  ;;  %v225_v15 = vshll.u32 %v532_v14, %v222_v3 }
 0x1dc   :  { %v228_v18 = vshll.u32 %v533_v16, %v222_v3  ;;  %v231_v21 = vshll.u32 %v534_v19, %v222_v3  ;;  %vm243_vm2 = vcmp.lt.s32.totalorder %v221_v4, 4  ;;  %vm240_vm3 = vcmp.lt.s32.totalorder %v221_v4, 1 }
 0x1dd   :  { %v235_v11 = vshrl.u32 %v530_v8, %v223_v5  ;;  %v238_v13 = vshrl.u32 %v531_v12, %v223_v5  ;;  %v226_v17 = vshrl.u32 %v533_v16, %v223_v5  ;;  %v229_v20 = vshrl.u32 %v534_v19, %v223_v5 }
 0x1de   :  { %v232_v22 = vshrl.u32 %v529_v6, %v223_v5  ;;  %v224_v26 = vshrl.u32 %v532_v14, %v223_v5  ;;  %vm241_vm4 = vcmp.lt.s32.totalorder %v221_v4, 2  ;;  %vm242_vm5 = vcmp.lt.s32.totalorder %v221_v4, 3 }
 0x1df   :  { %v236_v23 = vor.u32 %v235_v11, %v234_v7  ;;  %v239_v24 = vor.u32 %v238_v13, %v237_v9  ;;  %v227_v25 = vor.u32 %v226_v17, %v225_v15  ;;  %v230_v27 = vor.u32 %v229_v20, %v228_v18 }
 0x1e0   :  { %v233_v28 = vor.u32 %v232_v22, %v231_v21 }
 0x1e1   :  { %v249_v29 = vsel %vm243_vm2, %v236_v23, 920167782  ;;  %v253_v30 = vsel %vm243_vm2, %v239_v24, 1326507024  ;;  %v248_v32 = vsel %vm240_vm3, %v227_v25, %v230_v27  ;;  %v244_v35 = vsel %vm240_vm3, %v224_v26, %v227_v25 }
 0x1e2   :  { %v245_v31 = vsel %vm243_vm2, %v233_v28, 2102212464  ;;  %v250_v33 = vsel %vm242_vm5, %v233_v28, %v249_v29  ;;  %v252_v34 = vsel %vm240_vm3, %v230_v27, %v233_v28  ;;  %v254_v38 = vsel %vm242_vm5, %v236_v23, %v253_v30 }
 0x1e3   :  { %v246_v36 = vsel %vm242_vm5, %v230_v27, %v245_v31  ;;  %v251_v37 = vsel %vm241_vm4, %v248_v32, %v250_v33  ;;  %v255_v39 = vsel %vm241_vm4, %v252_v34, %v254_v38 }
 0x1e4   :  { %v693_v40 = vmul.u32.u64.low %v256_v10, %v251_v37  ;;  %v694_v41 = vmul.u32.u64.high %v256_v10, %v251_v37, %v693_v40  ;;  %v696_v42 = vmul.u32.u64.low %v256_v10, %v255_v39  ;;  %v697_v43 = vmul.u32.u64.high %v256_v10, %v255_v39, %v696_v42 }
 0x1e5   :  { %v247_v44 = vsel %vm241_vm4, %v244_v35, %v246_v36 }
 0x1e6   :  { %v266_v45 = vadd.s32 1, %v694_v41  ;;  %v263_v46 = vmul.u32 %v256_v10, %v247_v44  ;;  %vm265_vm6 = vc.u32 %v697_v43, %v693_v40  ;;  %v264_v59 = vadd.s32 %v693_v40, %v697_v43 }
 0x1e8   :  { %v267_v47 = vsel %vm265_vm6, %v266_v45, %v694_v41 }
 0x1e9   :  { %v268_v48 = vadd.s32 %v267_v47, %v263_v46 }
 0x1eb   :  { %v269_v49 = vadd.s32 536870912, %v268_v48 }
 0x1ed   :  { %v270_v50 = vshrl.u32 %v269_v49, 30 }
 0x1ef   :  { %v271_v51 = vshll.u32 %v270_v50, 30  ;;  %v294_v10 = vsub.s32 4, %v270_v50 }
 0x1f1   :  { %v272_v52 = vsub.s32 %v268_v48, %v271_v51  ;;  %v295_v12 = vsel %vm210_vm8, %v294_v10, %v270_v50 }
 0x1f2   :  { %v297_v13 = vsel %vm209_vm9, 0, %v295_v12 }
 0x1f3   :  { %v274_v53 = vsub.s32 0, %v272_v52  ;;  %v301_v14 = vand.u32 3, %v297_v13 }
 0x1f5   :  { %v329_v54 = vmin.u32 %v274_v53, %v272_v52  ;;  %vm306_vm10 = vcmp.eq.s32.totalorder %v301_v14, 2  ;;  %vm303_vm11 = vcmp.eq.s32.totalorder %v301_v14, 0  ;;  %vm302_vm12 = vcmp.lt.s32.totalorder %v301_v14, 2 }
 0x1f7   :  { %v276_v55 = vclz %v329_v54 }
 0x1f9   :  { %v330_v56 = vadd.s32 4294967294, %v276_v55 }
 0x1fb   :  { %vm331_vm7 = vcmp.lt.s32.totalorder %v330_v56, 0 }
 0x1fc   :  { %v279_v58 = vsel %vm331_vm7, 0, %v330_v56 }
 0x1fd   :  { %v280_v61 = vsub.s32 32, %v279_v58  ;;  %v284_v62 = vsub.s32 4294967266, %v279_v58  ;;  %v281_v63 = vshll.u32 %v272_v52, %v279_v58 }
 0x1ff   :  { %v282_v0 = vshrl.u32 %v264_v59, %v280_v61  ;;  %v285_v1 = vadd.s32 127, %v284_v62 }
 0x201   :  { %v283_v2 = vor.u32 %v282_v0, %v281_v63  ;;  %v286_v3 = vshll.u32 %v285_v1, 23 }
 0x203   :  { %v287_v4 = vor.u32 4788187, %v286_v3  ;;  %v290_v6 = vcvt.s32.f32 %v283_v2 }
 0x205   :  { %v288_v5 = vand.u32 2147483647, %v287_v4 }
 0x207   :  { %v291_v7 = vmul.f32 %v290_v6, %v288_v5 }
 0x209   :  { %v292_v8 = vxor.u32 2147483648, %v291_v7 }
 0x20b   :  { %v293_v9 = vsel %vm210_vm8, %v292_v8, %v291_v7 }
 0x20c   :  { %v296_v11 = vsel %vm209_vm9, %v687_v57, %v293_v9 }
 0x20d   :  { %498 = vcosq.f32 %v296_v11 }
 0x20e   :  { %500 = vsinq.f32 %v296_v11 }
 0x217   :  { %v499_v15 = vpop.eup %498 }
 0x218   :  { %v501_v16 = vpop.eup %500  ;;  %v307_v17 = vxor.u32 2147483648, %v499_v15 }
 0x219   :  { %v304_v18 = vxor.u32 2147483648, %v501_v16 }
 0x21a   :  { %v308_v19 = vsel %vm306_vm10, %v307_v17, %v501_v16 }
 0x21b   :  { %v305_v60 = vsel %vm303_vm11, %v499_v15, %v304_v18 }
 0x21c   :  { %v309_v20 = vsel %vm302_vm12, %v305_v60, %v308_v19 }
 0x21d   :  { %v310_v21 = vsel %vm300_vm13, nan, %v309_v20 }
 0x21e   :  { %311 = vst [vmem:[#allocation2] sm:$0xff] %v310_v21 }
 0x21f   :  { %513 = shalt.err (!%p510_p4)
}
 0x220   :  { %s514_s13 = scalar_lea.hbm %s725_s5, 128 }
 0x221   :  { %p515_p5 = scmp.ne.s32.totalorder %s725_s5, %s514_s13  ;;  %p518_p6 = scmp.lt.u32.totalorder %s514_s13, %s725_s5 }
 0x223   :  { %p520_p7 = pnand %p518_p6, %p515_p5 }
 0x225   :  { %523 = shalt.err (!%p520_p7)
}
 0x226   :  { %321 = dma.vmem_to_hbm [thread:$0]  %s319_s3, 128, %s725_s5, [#allocation3]  }
 0x227   :  { %524 = dma.done.wait [#allocation3], 128  }
 0x228   :  { %525 = vsyncadd [#allocation3], 4294967168 }
 0x229   :  { %325 = vsyncpa [#allocation3], 1 }

</bundles_post_ra>
